<compile_context>
chip_gen: v6e
topology: v6e:2x2x1
jax: 0.10.0
libtpu: 0.0.40
codegen_flags: <defaults>
</compile_context>

<pallas_src>
import jax
import jax.numpy as jnp
from jax.experimental import pallas as pl
from jax.experimental.pallas import tpu as pltpu


def _make_deq_linear_kernel(scale, offset):
    """Builds the kernel with the linspace-codebook affine constants as immediates."""

    def kernel(x_ref, wq_ref, absmax_ref, bias_ref, o_ref, rowsum_ref):
        k = pl.program_id(2)

        @pl.when(k == 0)
        def _():
            o_ref[...] = jnp.zeros_like(o_ref)
            rowsum_ref[...] = jnp.zeros_like(rowsum_ref)

        # Blockwise dequant distributed over the matmul:
        #   w[k, n] = (scale * q[k, n] + offset) * absmax[n]
        #   x @ w   = (scale * (x @ q) + offset * rowsum(x)) * absmax
        # Only per-element weight work left: one i8 -> bf16 cast (exact for int8).
        x = x_ref[...].astype(jnp.bfloat16)      # no-op if x already streams bf16
        w = wq_ref[...].astype(jnp.bfloat16)     # raw signed int8 codes -> exact bf16

        o_ref[...] += jnp.dot(x, w, preferred_element_type=jnp.float32)
        rowsum_ref[...] += jnp.sum(x.astype(jnp.float32), axis=-1, keepdims=True)

        @pl.when(k == pl.num_programs(2) - 1)
        def _():
            # absmax is constant over k for a given output feature (blocksize % K == 0),
            # so scale / offset / absmax / bias are all applied once here on the
            # lane-dense (tm, tn) / (1, tn) tiles.
            o_ref[...] = ((scale * o_ref[...] + offset * rowsum_ref[...])
                          * absmax_ref[...] + bias_ref[...])

    return kernel


def prepare_frozen_bnb_weight(weight_u8, absmax, code, *, blocksize=4096):
    """One-time (model-load) preprocessing of the *frozen* quantized weight.

    Hoisted out of the forward pass so the N*K int16 shift + int8 transpose and the
    host round-trip for the codebook constants are not re-done every step.
    """
    N, K = weight_u8.shape
    # Each quantization block (`blocksize` flat elems) covers whole weight rows, so
    # absmax expands to a per-output-feature scale.
    # TODO(synk): general blocksize % K != 0 needs per-K-block absmax applied inside
    # the reduction (tk aligned to quantization block boundaries) instead of this.
    assert blocksize % K == 0, "per-row absmax expansion requires blocksize % K == 0"
    rows_per_block = blocksize // K

    # (K, N) layout -> plain row-major MXU feed; u8 -> i8 shift so the in-kernel cast
    # is a plain signed int8 -> bf16 convert.
    wq_kn = jnp.transpose((weight_u8.astype(jnp.int16) - 128).astype(jnp.int8))  # (K, N)
    absmax_col = jnp.repeat(absmax.astype(jnp.float32), rows_per_block).reshape(1, N)

    # Affine decode constants for code = linspace(-1, 1, 256), pulled to host once:
    #   code[u8] = i8 * step + (code[0] + 128 * step)
    # TODO(synk): a non-linear codebook (bitsandbytes' dynamic map) would need a
    # 256-entry VMEM table lookup in the kernel instead of this affine closed form.
    scale = float(code[1] - code[0])
    offset = float(code[0]) + 128.0 * scale
    return wq_kn, absmax_col, scale, offset


def frozen_bnb_linear(x, wq_kn, absmax_col, scale, offset, bias, *,
                      tm=512, tn=512, tk=1024):
    """Forward of FrozenBNBLinear: dequantize_blockwise(weight) then F.linear(x, w, b)."""
    K, N = wq_kn.shape
    B, S, _ = x.shape
    M = B * S

    if bias is None:
        bias = jnp.zeros((N,), jnp.float32)
    bias2d = bias.reshape(1, N).astype(jnp.float32)

    # ---- tile selection ----
    tm = min(tm, M)
    tn = min(tn, N)
    tk = min(tk, K)
    # v7x megacore guard: with a single block along M (decode / single token), split N
    # into >= 2 blocks so both TensorCores get parallel work (keep tn lane-aligned).
    if M // tm == 1 and N // tn == 1 and N % 256 == 0:
        tn = N // 2
    assert M % tm == 0 and N % tn == 0 and K % tk == 0
    grid = (M // tm, N // tn, K // tk)

    # x streaming dtype: a standalone wrapper-side f32 -> bf16 cast pass only pays off
    # when x is re-streamed enough times; otherwise stream f32 and cast per tile.
    if grid[1] >= 3:
        x2d = x.reshape(M, K).astype(jnp.bfloat16)
    else:
        x2d = x.reshape(M, K)
    x_bytes = x2d.dtype.itemsize

    # Explicit scoped-VMEM budget (re-derived for v7x's 64 MiB physical VMEM):
    # double-buffered x / int8-weight / absmax / bias / f32-output blocks + rowsum.
    per_step = (tm * tk * x_bytes + tk * tn * 1 + 2 * tn * 4 + tm * tn * 4) * 2 \
               + tm * 128 * 4
    vmem_limit = int(min(48 << 20, max(32 << 20, 4 * per_step)))

    cost = pl.CostEstimate(
        flops=2 * M * N * K,
        transcendentals=0,
        bytes_accessed=(K * N * 1) * grid[0]          # int8 weight stream (per i block)
                       + (M * K * x_bytes) * grid[1]  # x stream (per j block)
                       + M * N * 4                    # f32 output
                       + 2 * N * 4,                   # absmax + bias
    )

    # NOTE: for latency-bound small-M shapes, pipeline_mode=pl.Buffered(3) on the
    # int8 weight BlockSpec is a further knob to hide the exposed weight DMA.
    out2d = pl.pallas_call(
        _make_deq_linear_kernel(scale, offset),
        out_shape=jax.ShapeDtypeStruct((M, N), jnp.float32),
        grid_spec=pltpu.PrefetchScalarGridSpec(
            num_scalar_prefetch=0,
            grid=grid,
            in_specs=[
                pl.BlockSpec((tm, tk), lambda i, j, k: (i, k)),   # x
                pl.BlockSpec((tk, tn), lambda i, j, k: (k, j)),   # weight codes, int8, (K, N)
                pl.BlockSpec((1, tn), lambda i, j, k: (0, j)),    # per-feature absmax
                pl.BlockSpec((1, tn), lambda i, j, k: (0, j)),    # bias
            ],
            out_specs=pl.BlockSpec((tm, tn), lambda i, j, k: (i, j)),
            scratch_shapes=[pltpu.VMEM((tm, 1), jnp.float32)],    # running rowsum(x)
        ),
        compiler_params=pltpu.CompilerParams(
            dimension_semantics=("parallel", "parallel", "arbitrary"),
            vmem_limit_bytes=vmem_limit),
        cost_estimate=cost,
    )(x2d, wq_kn, absmax_col, bias2d)

    return out2d.reshape(B, S, N)


def quantize_blockwise_jax(w, code, blocksize):
    """JAX analogue of quantize_blockise_lowmemory: flat blockwise 8-bit quantization."""
    flat = w.reshape(-1)
    assert flat.size % blocksize == 0
    blocks = flat.reshape(-1, blocksize)
    absmax = jnp.max(jnp.abs(blocks), axis=1)
    normed = blocks / jnp.maximum(absmax[:, None], 1e-30)   # guard all-zero blocks
    # code is linspace(-1, 1, 256), so the nearest-code index has a closed form.
    idx = jnp.clip(jnp.round((normed + 1.0) * 127.5), 0, 255).astype(jnp.uint8)
    return idx.reshape(w.shape), absmax


if __name__ == "__main__":
    B, S, K, N = 2, 8, 512, 256          # batch, seq, in_features, out_features
    BLOCKSIZE = 4096                      # bnb blockwise quantization block size

    key = jax.random.PRNGKey(0)
    kx, kw, kb = jax.random.split(key, 3)
    x = jax.random.normal(kx, (B, S, K), dtype=jnp.float32)
    w_fp = jax.random.normal(kw, (N, K), dtype=jnp.float32) * 0.05
    bias = jax.random.normal(kb, (N,), dtype=jnp.float32) * 0.1

    code = jnp.linspace(-1.0, 1.0, 256, dtype=jnp.float32)     # codebook buffer
    weight_u8, absmax = quantize_blockwise_jax(w_fp, code, BLOCKSIZE)

    # ---- model-load time: one-time preprocessing of the frozen weight ----
    wq_kn, absmax_col, scale, offset = prepare_frozen_bnb_weight(
        weight_u8, absmax, code, blocksize=BLOCKSIZE)

    # ---- forward ----
    out = frozen_bnb_linear(x, wq_kn, absmax_col, scale, offset, bias)
    out = jax.block_until_ready(out)

    # Pure-JAX f32 reference of DequantizeAndLinear.forward (dequant + F.linear).
    w_deq = (code[weight_u8.astype(jnp.int32)].reshape(-1, BLOCKSIZE)
             * absmax[:, None]).reshape(N, K)
    ref = jnp.einsum("bsk,nk->bsn", x, w_deq) + bias

    assert out.shape == (B, S, N) and out.dtype == jnp.float32
    # Only remaining drift source is the x -> bf16 cast feeding the MXU (the int8
    # weight codes convert to bf16 exactly); the 8-bit weight quantization error
    # still dominates end-to-end accuracy.
    assert jnp.allclose(out, ref, atol=5e-2, rtol=5e-2), \
        float(jnp.max(jnp.abs(out - ref)))
    print("KERNEL_OK")
</pallas_src>

<mosaic_0001>
module attributes {stable_mosaic.version = 11 : i64} {
  func.func @kernel(%arg0: i32, %arg1: i32, %arg2: i32, %arg3: memref<16x512xf32, #tpu.memory_space<vmem>>, %arg4: memref<512x128xi8, #tpu.memory_space<vmem>>, %arg5: memref<1x128xf32, #tpu.memory_space<vmem>>, %arg6: memref<1x128xf32, #tpu.memory_space<vmem>>, %arg7: memref<16x128xf32, #tpu.memory_space<vmem>>, %arg8: memref<16x1xf32, #tpu.memory_space<vmem>>) attributes {dimension_semantics = [#tpu.dimension_semantics<parallel>, #tpu.dimension_semantics<parallel>, #tpu.dimension_semantics<arbitrary>], iteration_bounds = array<i64: 1, 2, 1>, scalar_prefetch = 0 : i64, scratch_operands = 1 : i64, tpu.core_type = #tpu.core_type<tc>, window_params = [{transform_indices = @transform_0, window_bounds = array<i64: 16, 512>}, {transform_indices = @transform_1, window_bounds = array<i64: 512, 128>}, {transform_indices = @transform_2, window_bounds = array<i64: 1, 128>}, {transform_indices = @transform_3, window_bounds = array<i64: 1, 128>}, {transform_indices = @transform_4, window_bounds = array<i64: 16, 128>}]} {
    %c0_i32 = arith.constant 0 : i32
    %0 = arith.cmpi eq, %arg2, %c0_i32 : i32
    %1 = arith.extui %0 : i1 to i32
    %c0_i32_0 = arith.constant 0 : i32
    %2 = arith.cmpi ne, %1, %c0_i32_0 : i32
    scf.if %2 {
      %cst_15 = arith.constant 0.000000e+00 : f32
      %20 = vector.broadcast %cst_15 : f32 to vector<16x128xf32>
      %c0_16 = arith.constant 0 : index
      %c0_17 = arith.constant 0 : index
      %21 = vector.load %arg7[%c0_16, %c0_17] : memref<16x128xf32, #tpu.memory_space<vmem>>, vector<16x128xf32>
      tpu.vector_store %arg7[%c0_16, %c0_17], %20 {strides = array<i32>} : memref<16x128xf32, #tpu.memory_space<vmem>>, vector<16x128xf32>,
      %cst_18 = arith.constant 0.000000e+00 : f32
      %22 = vector.broadcast %cst_18 : f32 to vector<16x1xf32>
      %c0_19 = arith.constant 0 : index
      %c0_20 = arith.constant 0 : index
      %23 = vector.load %arg8[%c0_19, %c0_20] : memref<16x1xf32, #tpu.memory_space<vmem>>, vector<16x1xf32>
      tpu.vector_store %arg8[%c0_19, %c0_20], %22 {strides = array<i32>} : memref<16x1xf32, #tpu.memory_space<vmem>>, vector<16x1xf32>,
    } else {
    }
    %c0 = arith.constant 0 : index
    %c0_1 = arith.constant 0 : index
    %3 = vector.load %arg3[%c0, %c0_1] : memref<16x512xf32, #tpu.memory_space<vmem>>, vector<16x512xf32>
    %4 = arith.truncf %3 : vector<16x512xf32> to vector<16x512xbf16>
    %c0_2 = arith.constant 0 : index
    %c0_3 = arith.constant 0 : index
    %5 = vector.load %arg4[%c0_2, %c0_3] : memref<512x128xi8, #tpu.memory_space<vmem>>, vector<512x128xi8>
    %6 = arith.sitofp %5 : vector<512x128xi8> to vector<512x128xbf16>
    %c0_4 = arith.constant 0 : index
    %c0_5 = arith.constant 0 : index
    %7 = vector.load %arg7[%c0_4, %c0_5] : memref<16x128xf32, #tpu.memory_space<vmem>>, vector<16x128xf32>
    %cst = arith.constant dense<0.000000e+00> : vector<16x128xf32>
    %8 = tpu.matmul %4, %6, %cst {dimension_numbers = #tpu.dot_dimension_numbers<[1], [0], [0], [1], [0, 0, 1, 1], [], []>} : vector<16x512xbf16>, vector<512x128xbf16>, vector<16x128xf32> -> vector<16x128xf32>
    %9 = arith.addf %7, %8 : vector<16x128xf32>
    %c0_6 = arith.constant 0 : index
    %c0_7 = arith.constant 0 : index
    %10 = vector.load %arg7[%c0_6, %c0_7] : memref<16x128xf32, #tpu.memory_space<vmem>>, vector<16x128xf32>
    tpu.vector_store %arg7[%c0_6, %c0_7], %9 {strides = array<i32>} : memref<16x128xf32, #tpu.memory_space<vmem>>, vector<16x128xf32>,
    %c0_8 = arith.constant 0 : index
    %c0_9 = arith.constant 0 : index
    %11 = vector.load %arg8[%c0_8, %c0_9] : memref<16x1xf32, #tpu.memory_space<vmem>>, vector<16x1xf32>
    %12 = arith.extf %4 : vector<16x512xbf16> to vector<16x512xf32>
    %cst_10 = arith.constant dense<0.000000e+00> : vector<16xf32>
    %13 = vector.multi_reduction <add>, %12, %cst_10 [1] : vector<16x512xf32> to vector<16xf32>
    %14 = vector.shape_cast %13 : vector<16xf32> to vector<16x1xf32>
    %15 = arith.addf %11, %14 : vector<16x1xf32>
    %c0_11 = arith.constant 0 : index
    %c0_12 = arith.constant 0 : index
    %16 = vector.load %arg8[%c0_11, %c0_12] : memref<16x1xf32, #tpu.memory_space<vmem>>, vector<16x1xf32>
    tpu.vector_store %arg8[%c0_11, %c0_12], %15 {strides = array<i32>} : memref<16x1xf32, #tpu.memory_space<vmem>>, vector<16x1xf32>,
    %c0_i32_13 = arith.constant 0 : i32
    %17 = arith.cmpi eq, %arg2, %c0_i32_13 : i32
    %18 = arith.extui %17 : i1 to i32
    %c0_i32_14 = arith.constant 0 : i32
    %19 = arith.cmpi ne, %18, %c0_i32_14 : i32
    scf.if %19 {
      %c0_15 = arith.constant 0 : index
      %c0_16 = arith.constant 0 : index
      %20 = vector.load %arg7[%c0_15, %c0_16] : memref<16x128xf32, #tpu.memory_space<vmem>>, vector<16x128xf32>
      %cst_17 = arith.constant 0.00784313678 : f32
      %21 = vector.broadcast %cst_17 : f32 to vector<16x128xf32>
      %22 = arith.mulf %21, %20 : vector<16x128xf32>
      %c0_18 = arith.constant 0 : index
      %c0_19 = arith.constant 0 : index
      %23 = vector.load %arg8[%c0_18, %c0_19] : memref<16x1xf32, #tpu.memory_space<vmem>>, vector<16x1xf32>
      %cst_20 = arith.constant 0.00392150879 : f32
      %24 = vector.broadcast %cst_20 : f32 to vector<16x1xf32>
      %25 = arith.mulf %24, %23 : vector<16x1xf32>
      %26 = vector.broadcast %25 : vector<16x1xf32> to vector<16x128xf32>
      %27 = arith.addf %22, %26 : vector<16x128xf32>
      %c0_21 = arith.constant 0 : index
      %c0_22 = arith.constant 0 : index
      %28 = vector.load %arg5[%c0_21, %c0_22] : memref<1x128xf32, #tpu.memory_space<vmem>>, vector<1x128xf32>
      %29 = vector.broadcast %28 : vector<1x128xf32> to vector<16x128xf32>
      %30 = arith.mulf %27, %29 : vector<16x128xf32>
      %c0_23 = arith.constant 0 : index
      %c0_24 = arith.constant 0 : index
      %31 = vector.load %arg6[%c0_23, %c0_24] : memref<1x128xf32, #tpu.memory_space<vmem>>, vector<1x128xf32>
      %32 = vector.broadcast %31 : vector<1x128xf32> to vector<16x128xf32>
      %33 = arith.addf %30, %32 : vector<16x128xf32>
      %c0_25 = arith.constant 0 : index
      %c0_26 = arith.constant 0 : index
      %34 = vector.load %arg7[%c0_25, %c0_26] : memref<16x128xf32, #tpu.memory_space<vmem>>, vector<16x128xf32>
      tpu.vector_store %arg7[%c0_25, %c0_26], %33 {strides = array<i32>} : memref<16x128xf32, #tpu.memory_space<vmem>>, vector<16x128xf32>,
    } else {
    }
    return
  }
  func.func @transform_0(%arg0: i32, %arg1: i32, %arg2: i32) -> (i32, i32) {
    %c0_i32 = arith.constant 0 : i32
    return %arg0, %arg2 : i32, i32
  }
  func.func @transform_1(%arg0: i32, %arg1: i32, %arg2: i32) -> (i32, i32) {
    %c0_i32 = arith.constant 0 : i32
    return %arg2, %arg1 : i32, i32
  }
  func.func @transform_2(%arg0: i32, %arg1: i32, %arg2: i32) -> (i32, i32) {
    %c0_i32 = arith.constant 0 : i32
    %c0_i32_0 = arith.constant 0 : i32
    return %c0_i32, %arg1 : i32, i32
  }
  func.func @transform_3(%arg0: i32, %arg1: i32, %arg2: i32) -> (i32, i32) {
    %c0_i32 = arith.constant 0 : i32
    %c0_i32_0 = arith.constant 0 : i32
    return %c0_i32, %arg1 : i32, i32
  }
  func.func @transform_4(%arg0: i32, %arg1: i32, %arg2: i32) -> (i32, i32) {
    %c0_i32 = arith.constant 0 : i32
    return %arg0, %arg1 : i32, i32
  }
}

</mosaic_0001>

<bundles_post_ra>
// kernel: tpu_custom_call.1
= control target key start
LH: loop header
LB: loop body
LE: loop exit
PB: predicated region body
PF: predicated region fallthrough
CT: control target
= control target key end

     0   :  { %9 = vsyncpa [#allocation4], 0  ;;  %s1206_s0 = inlined_call_operand.hbm [shape: f32[16,512], index: 0, kind: input, shape index: {}]   ;;  %s1207_s1 = inlined_call_operand.hbm [shape: s8[512,256], index: 1, kind: input, shape index: {}]   ;;  %s1208_s2 = inlined_call_operand.vmem [shape: f32[1,256], index: 2, kind: input, shape index: {}]   ;;  %s1209_s3 = inlined_call_operand.vmem [shape: f32[1,256], index: 3, kind: input, shape index: {}]   ;;  %s1210_s4 = inlined_call_operand.hbm [shape: f32[16,256], index: 4, kind: output, shape index: {}]  }
   0x1   :  { %10 = vsyncpa [#allocation7], 0 }
   0x2   :  { %12 = vsyncpa [#allocation7 + $0x1], 0 }
   0x3   :  { %13 = vsyncpa [#allocation5], 0 }
   0x4   :  { %15 = vsyncpa [#allocation5 + $0x1], 0  ;;  %s990_s15 = smov 0   ;;  %s992_s16 = smov 0  }
   0x5   :  { %s994_s17 = smov 0   ;;  %s996_s18 = smov 0  }
   0x6   :  { %s998_s19 = smov 0   ;;  %s1000_s20 = smov 0  }
   0x7 LB: > { %1217 = sst [smem:[#allocation12_spill]] %s930_s15  ;;  %s666_s21 = sadd.s32 4294967295, %s950_s20   ;;  %s950_s20 = sphi %s1000_s20, %s21_s20   ;;  %s946_s19 = sphi %s998_s19, %s1240_s19   ;;  %s942_s18 = sphi %s996_s18, %s1239_s18   ;;  %s938_s17 = sphi %s994_s17, %s1238_s17   ;;  %s934_s16 = sphi %s992_s16, %s1237_s16   ;;  %s930_s15 = sphi %s990_s15, %s1236_s15  }
   0x8   : > { %1218 = sst [smem:[#allocation13_spill]] %s950_s20  ;;  %s667_s22 = sadd.s32 4294967294, %s950_s20  }
   0x9   : > { %p84_p0 = scmp.ne.s32.totalorder %s938_s17, %s934_s16  ;;  %p85_p1 = scmp.eq.s32.totalorder %s950_s20, 0 }
   0xa   : > { %p90_p2 = scmp.ne.s32.totalorder %s934_s16, %s930_s15  ;;  %p1027_p3 = scmp.eq.s32.totalorder %s666_s21, 0 }
   0xb   : > { %p1031_p4 = por %p85_p1, %p84_p0  ;;  %p168_p5 = scmp.eq.s32.totalorder %s666_s21, 1 }
   0xc   : > { %p1037_p6 = por %p1027_p3, %p90_p2  ;;  %p174_p7 = scmp.eq.s32.totalorder %s667_s22, 1 }
   0xd   : > { %p1041_p8 = por %p168_p5, %p84_p0  ;;  %p668_p9 = scmp.ge.s32.totalorder %s950_s20, 1 }
   0xe   : > { %s1221_s25 = scalar_select %p1037_p6, 1, 0 }
   0xf   : > { %s1222_s26 = scalar_select %p1041_p8, 1, 0 }
  0x10   : > { %p1046_p10 = por %p174_p7, %p90_p2  ;;  %p181_p11 = scmp.lt.s32.totalorder %s950_s20, 3 }
  0x11   : > { %s952_s29 = smov [#allocation3]   ;;  %p748_p1 = scmp.lt.s32.totalorder %s950_s20, 2 }
  0x12   : > { %s1223_s27 = scalar_select %p1046_p10, 1, 0 }
  0x13   : > { %p1051_p12 = pnand %p668_p9, %p181_p11  ;;  %s199_s30 = sshll.u32 %s952_s29, 4  ;;  %s200_s30 = int_to_ptr.vmem [resolvable:$true] %s199_s30 }
  0x14   : > { %1224 = sst [smem:[#allocation14_spill]] %s1223_s27  ;;  %p1067_p2 = pnand %p748_p1, %p1031_p4 }
  0x15   : > { %p735_p13 = pneg %p1051_p12  ;;  %s36_s7 = sadd.s32 1, %s946_s19 }
  0x16   : > { %s823_s8 = scalar_lea.vmem %s200_s30, 1024  ;;  %p831_p0 = scmp.lt.s32.totalorder %s200_s30, %s200_s30 }
  0x17   : > { %p1061_p5 = pnand %p735_p13, %p1027_p3  ;;  %p824_p9 = scmp.ne.s32.totalorder %s200_s30, %s823_s8 }
  0x18   : > { %p832_p8 = scmp.lt.s32.totalorder %s823_s8, %s823_s8 }
  0x19   : > { %p814_p7 = pneg %p1061_p5 }
  0x1a   : > { %p833_p6 = por %p832_p8, %p831_p0 }
  0x1b   : > { %p826_p11 = pnand %p824_p9, %p814_p7 }
  0x1d   : > { %p827_p10 = pneg %p826_p11 }
  0x1f   : > { %p834_p13 = pnand %p833_p6, %p827_p10 }
  0x21   : > { %837 = shalt.err (!%p834_p13)
}
  0x22   : > { %s953_s9 = smov 512   ;;  %s954_s10 = smov 32  }
  0x23   : > { %738 = dma.hbm_to_vmem [thread:$0]  (!%p1061_p5), %s1206_s0, 1024, %s200_s30, [#allocation4], %s953_s9, %s953_s9, %s954_s10  }
  0x24   : > { %p38_p4 = scmp.ge.s32.totalorder %s36_s7, 2  ;;  %s77_s13 = sadd.s32 1, %s938_s17 }
  0x25   : > { %s213_s14 = sand.u32 1, %s938_s17   ;;  %s672_s24 = sshll.u32 %s946_s19, 7 }
  0x26   : > { %s1242_s7 = smov (%p38_p4, %s36_s7), 0  ;;  %s671_s21 = sshll.u32 %s213_s14, 7 }
  0x27   : > { %s73_s22 = ssub.s32 %s946_s19, %s1242_s7  ;;  %s225_s20 = scalar_lea.hbm %s1207_s1, %s672_s24 }
  0x28   : > { %p75_p6 = scmp.eq.s32.totalorder %s73_s22, 0  ;;  %s217_s5 = scalar_lea.vmem [#allocation6], %s671_s21 }
  0x29   : > { %s226_s27 = sshll.u32 %s217_s5, 4  ;;  %s214_s30 = scalar_lea.sflag [#allocation7], %s213_s14  ;;  %s227_s27 = int_to_ptr.vmem [resolvable:$true] %s226_s27 }
  0x2a   : > { %s1090_s15 = scalar_select %p75_p6, %s938_s17, %s77_s13  }
  0x2b   : > { %p840_p8 = pneg %p1067_p2  ;;  %s851_s9 = scalar_lea.vmem %s227_s27, 2048 }
  0x2c   : > { %p852_p10 = scmp.ne.s32.totalorder %s227_s27, %s851_s9  ;;  %s955_s10 = smov [#allocation6]  }
  0x2d   : > { %s856_s11 = sshll.u32 %s955_s10, 4  ;;  %s857_s11 = int_to_ptr.vmem [resolvable:$false] %s856_s11 }
  0x2e   : > { %p854_p0 = pnand %p852_p10, %p840_p8  ;;  %s858_s12 = scalar_lea.vmem %s857_s11, 4096 }
  0x2f   : > { %p859_p5 = scmp.lt.s32.totalorder %s227_s27, %s857_s11  ;;  %p860_p7 = scmp.lt.s32.totalorder %s858_s12, %s851_s9 }
  0x30   : > { %p855_p1 = pneg %p854_p0 }
  0x31   : > { %p861_p9 = por %p860_p7, %p859_p5 }
  0x33   : > { %p862_p11 = pnand %p861_p9, %p855_p1 }
  0x35   : > { %865 = shalt.err (!%p862_p11)
}
  0x36   : > { %s956_s21 = smov 256   ;;  %s957_s13 = smov 128  }
  0x37   : > { %s958_s22 = smov 8   ;;  %250 = sbr.rel (%p1051_p12) target bundleno = 377 (0x179), region = 36 }
  0x38   : > { %742 = dma.hbm_to_vmem [thread:$0]  (!%p1067_p2), %s225_s20, 2048, %s227_s27, %s214_s30, %s956_s21, %s957_s13, %s958_s22  }
  0x3c   : > { %917 = dma.done.wait (%p1027_p3), [#allocation4], 1024  }
  0x3d   : > { %919 = vsyncadd (%p1027_p3), [#allocation4], 4294966272  ;;  %s1103_s14 = sand.u32 1, %s934_s16   ;;  %p1228_p2 = scmp.ne.s32.totalorder %s1221_s25, 0 }
  0x3e   : > { %s675_s24 = sshll.u32 %s1103_s14, 7  ;;  %s257_s29 = scalar_lea.sflag [#allocation7], %s1103_s14 }
  0x3f   : > { %s1107_s8 = scalar_lea.vmem [#allocation6], %s675_s24 }
  0x40   : > { %921 = dma.done.wait (%p1228_p2), %s257_s29, 2048  }
  0x41   : > { %923 = vsyncadd (%p1228_p2), %s257_s29, 4294965248  ;;  %vm308_vm0 = vcmask 7168   ;;  %v959_v0 = vmov 0.0   ;;  %v311_v1 = vld [vmem:[#allocation3] sm:$0xff]  ;;  %v312_v2 = vld [vmem:[#allocation3 + $0x8] sm:$0xff]  ;;  %p294_p3 = scmp.lt.s32.totalorder %s942_s18, 1 }
  0x42   : > { %309 = vst.msk [vmem:[#allocation2] sm:$0xff] %vm308_vm0, %v959_v0  ;;  %310 = vst.msk [vmem:[#allocation2 + $0x8] sm:$0xff] %vm308_vm0, %v959_v0  ;;  %v313_v3 = vld [vmem:[#allocation3 + $0x10] sm:$0xff]  ;;  %v314_v4 = vld [vmem:[#allocation3 + $0x18] sm:$0xff]  ;;  %s676_s30 = sshll.u32 %s1103_s14, 4  ;;  %s680_s9 = sshll.u32 %s942_s18, 7 }
  0x43   : > { %v315_v5 = vld [vmem:[#allocation3 + $0x20] sm:$0xff]  ;;  %v316_v6 = vld [vmem:[#allocation3 + $0x28] sm:$0xff]  ;;  %v317_v7 = vld [vmem:[#allocation3 + $0x30] sm:$0xff]  ;;  %s295_s20 = scalar_select %p294_p3, %s942_s18, 1 }
  0x44   : > { %v318_v8 = vld [vmem:[#allocation3 + $0x38] sm:$0xff]  ;;  %v1115_v9 = vpack.c.bf16 %v315_v5, %v311_v1  ;;  %v320_v10 = vpack.c.bf16 %v316_v6, %v312_v2  ;;  %v1118_v12 = vpack.c.bf16 %v317_v7, %v313_v3  ;;  %v329_v32 = vld [vmem:[%s1107_s8 + $0x30] sm:$0xff]  ;;  %v328_v49 = vld [vmem:[%s1107_s8 + $0x28] sm:$0xff]  ;;  %s290_s10 = scalar_lea.vmem [#allocation8], %s676_s30  ;;  %s1156_s13 = scalar_lea.hbm %s1210_s4, %s680_s9 }
  0x45   : > { %v330_v11 = vld [vmem:[%s1107_s8 + $0x38] sm:$0xff]  ;;  %v322_v13 = vpack.c.bf16 %v318_v8, %v314_v4  ;;  %v337_v33 = vld [vmem:[%s1107_s8 + $0x70] sm:$0xff]  ;;  %v352_v40 = vunpack.c.h.s8.bf16 %v329_v32  ;;  %v351_v47 = vunpack.c.l.s8.bf16 %v329_v32  ;;  %v336_v50 = vld [vmem:[%s1107_s8 + $0x68] sm:$0xff]  ;;  %v350_v53 = vunpack.c.h.s8.bf16 %v328_v49  ;;  %s296_s27 = scalar_lea.vmem %s1208_s2, %s295_s20  ;;  %s299_s5 = scalar_lea.vmem %s1209_s3, %s295_s20 }
  0x46   : > { %v354_v14 = vunpack.c.h.s8.bf16 %v330_v11  ;;  %v338_v15 = vld [vmem:[%s1107_s8 + $0x78] sm:$0xff]  ;;  %v461_v16 = vunpack.c.l.bf16 %v1115_v9  ;;  %v462_v17 = vunpack.c.l.bf16 %v320_v10  ;;  %v465_v18 = vunpack.c.h.bf16 %v1115_v9  ;;  %405 = vmatprep.mubr.bf16.mxu0 %v320_v10  ;;  %v325_v42 = vld [vmem:[%s1107_s8 + $0x10] sm:$0xff]  ;;  %v324_v55 = vld [vmem:[%s1107_s8 + $0x8] sm:$0xff]  ;;  %s543_s11 = sshll.u32 %s290_s10, 4  ;;  %s528_s22 = scalar_lea.sflag [#allocation5], %s1103_s14  ;;  %s1158_s11 = int_to_ptr.vmem [resolvable:$true] %s543_s11 }
  0x47   : > { %v466_v19 = vunpack.c.h.bf16 %v320_v10  ;;  %v326_v20 = vld [vmem:[%s1107_s8 + $0x18] sm:$0xff]  ;;  %v463_v22 = vunpack.c.l.bf16 %v1118_v12  ;;  %v464_v23 = vunpack.c.l.bf16 %v322_v13  ;;  %v467_v24 = vunpack.c.h.bf16 %v1118_v12  ;;  %446 = vmatprep.mubr.bf16.mxu1 %v322_v13  ;;  %v333_v43 = vld [vmem:[%s1107_s8 + $0x50] sm:$0xff]  ;;  %v332_v56 = vld [vmem:[%s1107_s8 + $0x48] sm:$0xff]  ;;  %s866_s18 = scalar_lea.vmem %s1158_s11, 256  ;;  %p1229_p13 = scmp.ne.s32.totalorder %s1222_s26, 0 }
  0x48   : > { %v334_v21 = vld [vmem:[%s1107_s8 + $0x58] sm:$0xff]  ;;  %v353_v25 = vunpack.c.l.s8.bf16 %v330_v11  ;;  %683 = vmatprep.subr.bf16.mxu0 %v354_v14  ;;  %v469_v26 = vadd.f32 %v462_v17, %v461_v16  ;;  %v369_v28 = vunpack.c.l.s8.bf16 %v338_v15  ;;  %v370_v29 = vunpack.c.h.s8.bf16 %v338_v15  ;;  %v327_v61 = vld [vmem:[%s1107_s8 + $0x20] sm:$0xff]  ;;  %p867_p12 = scmp.ne.s32.totalorder %s1158_s11, %s866_s18  ;;  %s961_s24 = smov [#allocation8]  }
  0x49   : > { %v474_v27 = vadd.f32 %v466_v19, %v465_v18  ;;  %v346_v30 = vunpack.c.h.s8.bf16 %v326_v20  ;;  %v362_v31 = vunpack.c.h.s8.bf16 %v334_v21  ;;  %v468_v35 = vunpack.c.h.bf16 %v322_v13  ;;  %v335_v62 = vld [vmem:[%s1107_s8 + $0x60] sm:$0xff]  ;;  %v459_v14 = vld [vmem:[#allocation2] sm:$0xff]  ;;  %v460_v17 = vld [vmem:[#allocation2 + $0x8] sm:$0xff]  ;;  %s870_s29 = sshll.u32 %s961_s24, 4  ;;  %s871_s29 = int_to_ptr.vmem [resolvable:$false] %s870_s29 }
  0x4a   : > { %v470_v34 = vadd.f32 %v469_v26, %v463_v22  ;;  %705 = vmatprep.subr.bf16.mxu1 %v370_v29  ;;  %v345_v37 = vunpack.c.l.s8.bf16 %v326_v20  ;;  %v361_v38 = vunpack.c.l.s8.bf16 %v334_v21  ;;  %v368_v41 = vunpack.c.h.s8.bf16 %v337_v33  ;;  %v323_v3 = vld [vmem:[%s1107_s8] sm:$0xff]  ;;  %p868_p4 = pnand %p867_p12, %p1229_p13  ;;  %p873_p8 = scmp.lt.s32.totalorder %s1158_s11, %s871_s29 }
  0x4b   : > { %v475_v36 = vadd.f32 %v474_v27, %v467_v24  ;;  %684 = vmatpush3.bf16.msra.mxu0 %v346_v30  ;;  %706 = vmatpush3.bf16.msra.mxu1 %v362_v31  ;;  %v344_v45 = vunpack.c.h.s8.bf16 %v325_v42  ;;  %v360_v46 = vunpack.c.h.s8.bf16 %v333_v43  ;;  %v367_v48 = vunpack.c.l.s8.bf16 %v337_v33  ;;  %v331_v4 = vld [vmem:[%s1107_s8 + $0x40] sm:$0xff]  ;;  %s872_s8 = scalar_lea.vmem %s871_s29, 512 }
  0x4c   : > { %v471_v39 = vadd.f32 %v470_v34, %v464_v23  ;;  %685 = vmatprep.subr.bf16.mxu0 %v353_v25  ;;  %707 = vmatprep.subr.bf16.mxu1 %v369_v28  ;;  %v343_v51 = vunpack.c.l.s8.bf16 %v325_v42  ;;  %v359_v52 = vunpack.c.l.s8.bf16 %v333_v43  ;;  %v366_v54 = vunpack.c.h.s8.bf16 %v336_v50  ;;  %p869_p6 = pneg %p868_p4  ;;  %p874_p10 = scmp.lt.s32.totalorder %s872_s8, %s866_s18 }
  0x4d   : > { %v476_v44 = vadd.f32 %v475_v36, %v468_v35  ;;  %v342_v57 = vunpack.c.h.s8.bf16 %v324_v55  ;;  %v358_v58 = vunpack.c.h.s8.bf16 %v332_v56  ;;  %v349_v59 = vunpack.c.l.s8.bf16 %v328_v49 }
  0x4e   : > { %472 = vadd.xlane.f32.xlu0 %v471_v39  ;;  %v365_v60 = vunpack.c.l.s8.bf16 %v336_v50  ;;  %v341_v63 = vunpack.c.l.s8.bf16 %v324_v55  ;;  %v357_v0 = vunpack.c.l.s8.bf16 %v332_v56  ;;  %v348_v1 = vunpack.c.h.s8.bf16 %v327_v61  ;;  %p875_p0 = por %p874_p10, %p873_p8 }
  0x4f   : > { %686 = vmatpush3.bf16.msra.mxu0 %v345_v37  ;;  %708 = vmatpush3.bf16.msra.mxu1 %v361_v38  ;;  %v364_v2 = vunpack.c.h.s8.bf16 %v335_v62  ;;  %v340_v5 = vunpack.c.h.s8.bf16 %v323_v3  ;;  %v356_v6 = vunpack.c.h.s8.bf16 %v331_v4  ;;  %v347_v7 = vunpack.c.l.s8.bf16 %v327_v61  ;;  %v677_v37 = vld [vmem:[%s296_s27] ss:$0 sm:$0xff] }
  0x50   : > { %687 = vmatprep.subr.bf16.mxu0 %v352_v40  ;;  %709 = vmatprep.subr.bf16.mxu1 %v368_v41  ;;  %v363_v8 = vunpack.c.l.s8.bf16 %v335_v62  ;;  %v960_v10 = vmov 0   ;;  %v339_v11 = vunpack.c.l.s8.bf16 %v323_v3  ;;  %v355_v13 = vunpack.c.l.s8.bf16 %v331_v4  ;;  %v678_v40 = vld [vmem:[%s299_s5] ss:$0 sm:$0xff]  ;;  %p876_p1 = pnand %p875_p0, %p869_p6 }
  0x51   : > { %810 = vset.pattern.permute.xlu1 %v960_v10  ;;  %811 = vset.pattern.permute.xlu0 %v960_v10 }
  0x52   : > { %477 = vadd.xlane.f32.xlu0 %v476_v44 }
  0x53   : > { %688 = vmatpush3.bf16.msra.mxu0 %v344_v45  ;;  %710 = vmatpush3.bf16.msra.mxu1 %v360_v46 }
  0x54   : > { %689 = vmatprep.subr.bf16.mxu0 %v351_v47  ;;  %711 = vmatprep.subr.bf16.mxu1 %v367_v48 }
  0x57   : > { %690 = vmatpush3.bf16.msra.mxu0 %v343_v51  ;;  %712 = vmatpush3.bf16.msra.mxu1 %v359_v52 }
  0x58   : > { %691 = vmatprep.subr.bf16.mxu0 %v350_v53  ;;  %713 = vmatprep.subr.bf16.mxu1 %v366_v54 }
  0x5b   : > { %692 = vmatpush3.bf16.msra.mxu0 %v342_v57  ;;  %714 = vmatpush3.bf16.msra.mxu1 %v358_v58 }
  0x5c   : > { %693 = vmatprep.subr.bf16.mxu0 %v349_v59  ;;  %715 = vmatprep.subr.bf16.mxu1 %v365_v60 }
  0x5f   : > { %694 = vmatpush3.bf16.msra.mxu0 %v341_v63  ;;  %716 = vmatpush3.bf16.msra.mxu1 %v357_v0 }
  0x60   : > { %695 = vmatprep.subr.bf16.mxu0 %v348_v1  ;;  %717 = vmatprep.subr.bf16.mxu1 %v364_v2 }
  0x63   : > { %696 = vmatpush3.bf16.msra.mxu0 %v340_v5  ;;  %718 = vmatpush3.bf16.msra.mxu1 %v356_v6 }
  0x64   : > { %697 = vmatprep.subr.bf16.mxu0 %v347_v7  ;;  %719 = vmatprep.subr.bf16.mxu1 %v363_v8 }
  0x67   : > { %698 = vmatpush3.bf16.msra.mxu0 %v339_v11  ;;  %720 = vmatpush3.bf16.msra.mxu1 %v355_v13 }
  0x6a   : > { %406 = vmatmul.mubr.bf16.vlgmr.msra.gmra.mxu0 %v1115_v9  ;;  %447 = vmatmul.mubr.bf16.vlgmr.msra.gmra.mxu1 %v1118_v12 }
  0xd7   : > { %v473_v15 = vpop.xlane.xlu0 %472 }
  0xd8   : > { %v479_v16 = vadd.f32 %v473_v15, %v459_v14 }
  0xda   : > { %482 = vst.msk [vmem:[#allocation2] sm:$0xff] %vm308_vm0, %v479_v16 }
  0xdb   : > { %v478_v18 = vpop.xlane.xlu0 %477 }
  0xdc   : > { %v480_v19 = vadd.f32 %v478_v18, %v460_v17 }
  0xde   : > { %483 = vst.msk [vmem:[#allocation2 + $0x8] sm:$0xff] %vm308_vm0, %v480_v19 }
  0xe1   : > { %v491_v20 = vld [vmem:[#allocation2] sm:$0xff] }
  0xe2   : > { %v493_v21 = vmul.f32 0.003921509, %v491_v20 }
  0xe4   : > { %497 = vperm.xlu1 %810, %v493_v21  }
  0xe5   : > { %v492_v22 = vld [vmem:[#allocation2 + $0x8] sm:$0xff] }
  0xe6   : > { %v494_v23 = vmul.f32 0.003921509, %v492_v22 }
  0xe8   : > { %502 = vperm.xlu1 %810, %v494_v23  }
 0x12a   : > { %v699_v9 = vpop.f32.mrf.mxu0  ;;  %v721_v12 = vpop.f32.mrf.mxu1 }
 0x12c   : > { %v700_v24 = vpop.f32.mrf.mxu0  ;;  %v722_v25 = vpop.f32.mrf.mxu1 }
 0x12d   : > { %v701_v28 = vadd.f32 %v700_v24, %v699_v9  ;;  %v723_v29 = vadd.f32 %v722_v25, %v721_v12 }
 0x12e   : > { %v702_v26 = vpop.f32.mrf.mxu0  ;;  %v724_v27 = vpop.f32.mrf.mxu1 }
 0x12f   : > { %v449_v32 = vadd.f32 %v723_v29, %v701_v28 }
 0x130   : > { %v703_v30 = vpop.f32.mrf.mxu0  ;;  %v725_v31 = vpop.f32.mrf.mxu1 }
 0x131   : > { %v704_v33 = vadd.f32 %v703_v30, %v702_v26  ;;  %v726_v34 = vadd.f32 %v725_v31, %v724_v27  ;;  %v489_v36 = vmul.f32 0.007843137, %v449_v32 }
 0x133   : > { %v452_v35 = vadd.f32 %v726_v34, %v704_v33 }
 0x135   : > { %v490_v42 = vmul.f32 0.007843137, %v452_v35 }
 0x15f   : > { %v498_v38 = vpop.permute.xlu1 %497 }
 0x160   : > { %v505_v39 = vadd.f32 %v498_v38, %v489_v36 }
 0x162   : > { %v514_v41 = vmul.f32 %v677_v37, %v505_v39 }
 0x163   : > { %v503_v43 = vpop.permute.xlu1 %502 }
 0x164   : > { %v523_v44 = vadd.f32 %v678_v40, %v514_v41  ;;  %v506_v45 = vadd.f32 %v503_v43, %v490_v42 }
 0x166   : > { %525 = vst [vmem:[%s290_s10] sm:$0xff] %v523_v44  ;;  %v515_v46 = vmul.f32 %v677_v37, %v506_v45 }
 0x168   : > { %v524_v47 = vadd.f32 %v678_v40, %v515_v46 }
 0x16a   : > { %526 = vst [vmem:[%s290_s10 + $0x8] sm:$0xff] %v524_v47 }
 0x16b   : > { %879 = shalt.err (!%p876_p1)
}
 0x16c   : > { %s880_s20 = scalar_lea.hbm %s1156_s13, 256  ;;  %s884_s27 = scalar_lea.hbm %s1210_s4, 512 }
 0x16d   : > { %p881_p5 = scmp.ne.s32.totalorder %s1156_s13, %s880_s20  ;;  %p885_p11 = scmp.lt.s32.totalorder %s1156_s13, %s1210_s4 }
 0x16e   : > { %p886_p2 = scmp.lt.s32.totalorder %s884_s27, %s880_s20 }
 0x16f   : > { %p882_p7 = pnand %p881_p5, %p1229_p13 }
 0x170   : > { %p887_p3 = por %p886_p2, %p885_p11 }
 0x171   : > { %p883_p9 = pneg %p882_p7 }
 0x173   : > { %p888_p12 = pnand %p887_p3, %p883_p9 }
 0x175   : > { %891 = shalt.err (!%p888_p12)
}
 0x176   : > { %s962_s5 = smov 128   ;;  %s963_s30 = smov 256  }
 0x177   : > { %s964_s9 = smov 8  }
 0x178   : > { %733 = dma.vmem_to_hbm [thread:$0]  (%p1229_p13), %s1158_s11, 256, %s1156_s13, %s528_s22, %s962_s5, %s963_s30, %s964_s9  }
 0x179 PF: > { %s1230_s10 = sld [smem:[#allocation12_spill]] }
 0x17a   : > { %s1231_s12 = sld [smem:[#allocation14_spill]] }
 0x17b   : > { %s1232_s21 = sld [smem:[#allocation13_spill]] }
 0x17f   : > { %s558_s18 = sand.u32 1, %s1230_s10  }
 0x180   : > { %p1233_p4 = scmp.ne.s32.totalorder %s1231_s12, 0  ;;  %s559_s24 = scalar_lea.sflag [#allocation5], %s558_s18 }
 0x181   : > { %p1234_p6 = scmp.ge.s32.totalorder %s1232_s21, 2 }
 0x183   : > { %p744_p8 = pnand %p1234_p6, %p1233_p4 }
 0x185   : > { %p745_p10 = pneg %p744_p8 }
 0x187   : > { %925 = dma.done.wait (%p745_p10), %s559_s24, 256  }
 0x188   : > { %927 = vsyncadd (%p745_p10), %s559_s24, 4294967040  ;;  %s21_s20 = sadd.s32 1, %s1232_s21   ;;  %s1235_s26 = smov %s1090_s15 }
 0x189   : > { %p18_p0 = scmp.ge.s32.totalorder %s21_s20, 4   ;;  %s1236_s15 = smov %s934_s16 }
 0x18a   : > { %s1237_s16 = smov %s938_s17  ;;  %s1238_s17 = smov %s1235_s26 }
 0x18b   : > { %s1239_s18 = smov %s946_s19  ;;  %s1240_s19 = smov %s1242_s7 }
 0x18c   :  { %20 = sbr.rel (!%p18_p0) target bundleno = 7 (0x7), region = 101 }
 0x191   :  { %564 = vsyncpa [#allocation4], 1 }
 0x192   :  { %566 = vsyncpa [#allocation4 + $0x1], 1 }
 0x193   :  { %567 = vsyncpa [#allocation7], 1 }
 0x194   :  { %569 = vsyncpa [#allocation7 + $0x1], 1 }
 0x195   :  { %570 = vsyncpa [#allocation5], 1 }
 0x196   :  { %572 = vsyncpa [#allocation5 + $0x1], 1 }

</bundles_post_ra>
